<compile_context>
chip_gen: v5e
topology: v5e:2x2
jax: 0.10.0
libtpu: 0.0.40
codegen_flags: <defaults>
</compile_context>

<pallas_src>
import functools

import jax
import jax.numpy as jnp
from jax import lax
from jax.experimental import pallas as pl
from jax.experimental.pallas import tpu as pltpu

LN_EPS = 1e-12  # DistilBERT LayerNorm eps


# ----------------------------- in-kernel helpers -----------------------------

def _layernorm(x, g, b):
    mu = jnp.mean(x, axis=-1, keepdims=True)
    var = jnp.mean(jnp.square(x - mu), axis=-1, keepdims=True)
    return (x - mu) * lax.rsqrt(var + LN_EPS) * g + b


def _gelu(x):
    # tanh approximation (see TODO above); computed in f32 on the VPU/EUP.
    c = 0.7978845608028654  # sqrt(2/pi)
    return 0.5 * x * (1.0 + jnp.tanh(c * (x + 0.044715 * x * x * x)))


# --------------------------------- kernels -----------------------------------

def _emb_layernorm_kernel(word_ref, pos_ref, g_ref, b_ref, o_ref):
    # word_ref: (1, S, H); pos_ref: (S, H); g/b: (1, H).  Fused add + LayerNorm.
    o_ref[0] = _layernorm(word_ref[0] + pos_ref[...], g_ref[...], b_ref[...])


def _layer_kernel(xq_ref, xkv_ref, mask_ref,
                  wq_ref, bq_ref, wk_ref, bk_ref, wv_ref, bv_ref,
                  wo_ref, bo_ref, ln1g_ref, ln1b_ref,
                  w1_ref, b1_ref, w2_ref, b2_ref, ln2g_ref, ln2b_ref,
                  o_ref, *, n_heads, head_dim):
    """One DistilBERT transformer block for one (batch, seq-tile) grid point."""
    xq = xq_ref[0]            # (Tq, H)  rows this grid step produces (query/FFN path)
    xkv = xkv_ref[0]          # (S,  H)  full sequence (key/value path)
    mask_add = mask_ref[0]    # (1,  S)  additive mask: 0.0 = attend, -1e9 = masked

    xq_lp = xq.astype(jnp.bfloat16)
    xkv_lp = xkv.astype(jnp.bfloat16)

    # --- fused full-width projections (bf16 MXU, f32 accumulation) ---
    # wq / bq are pre-scaled by 1/sqrt(head_dim) at parameter-prep time.
    q = jnp.dot(xq_lp, wq_ref[...], preferred_element_type=jnp.float32) + bq_ref[...]
    k = jnp.dot(xkv_lp, wk_ref[...], preferred_element_type=jnp.float32) + bk_ref[...]
    v = jnp.dot(xkv_lp, wv_ref[...], preferred_element_type=jnp.float32) + bv_ref[...]

    # --- per-head attention (only the 64-deep contractions stay per-head) ---
    ctx_parts = []
    for h in range(n_heads):
        sl = slice(h * head_dim, (h + 1) * head_dim)
        qh = q[:, sl].astype(jnp.bfloat16)     # (Tq, hd)
        kh = k[:, sl].astype(jnp.bfloat16)     # (S,  hd)
        vh = v[:, sl].astype(jnp.bfloat16)     # (S,  hd)
        # scores: contract last dims directly (no explicit transpose of kh)
        s = lax.dot_general(qh, kh, (((1,), (1,)), ((), ())),
                            preferred_element_type=jnp.float32)          # (Tq, S) f32
        s = s + mask_add
        m = jnp.max(s, axis=-1, keepdims=True)
        p = jnp.exp(s - m)
        p = p * pl.reciprocal(jnp.sum(p, axis=-1, keepdims=True), approx=True)
        ctx_parts.append(
            jnp.dot(p.astype(jnp.bfloat16), vh,
                    preferred_element_type=jnp.float32).astype(jnp.bfloat16))
    ctx = jnp.concatenate(ctx_parts, axis=-1)                            # (Tq, H) bf16

    # --- single full-width output projection + residual + sa_layer_norm ---
    attn = jnp.dot(ctx, wo_ref[...], preferred_element_type=jnp.float32) + bo_ref[...]
    h1 = _layernorm(xq + attn, ln1g_ref[...], ln1b_ref[...])

    # --- FFN (lin1 -> GELU -> lin2), residual + output_layer_norm ---
    f = jnp.dot(h1.astype(jnp.bfloat16), w1_ref[...],
                preferred_element_type=jnp.float32) + b1_ref[...]
    f = _gelu(f)
    f = jnp.dot(f.astype(jnp.bfloat16), w2_ref[...],
                preferred_element_type=jnp.float32) + b2_ref[...]
    o_ref[0] = _layernorm(h1 + f, ln2g_ref[...], ln2b_ref[...])


def _fc_kernel(x_ref, w_ref, b_ref, o_ref):
    # x_ref: (B, H) f32, w_ref: (H, Cpad) bf16, b_ref: (1, Cpad) f32 -> (B, Cpad) f32.
    o_ref[...] = jnp.dot(x_ref[...].astype(jnp.bfloat16), w_ref[...],
                         preferred_element_type=jnp.float32) + b_ref[...]


# --------------------------------- wrappers ----------------------------------

def embeddings_add_layernorm(word, pos, g, b):
    B, S, H = word.shape
    return pl.pallas_call(
        _emb_layernorm_kernel,
        grid=(B,),
        in_specs=[pl.BlockSpec((1, S, H), lambda i: (i, 0, 0)),
                  pl.BlockSpec((S, H), lambda i: (0, 0)),
                  pl.BlockSpec((1, H), lambda i: (0, 0)),
                  pl.BlockSpec((1, H), lambda i: (0, 0))],
        out_specs=pl.BlockSpec((1, S, H), lambda i: (i, 0, 0)),
        out_shape=jax.ShapeDtypeStruct((B, S, H), jnp.float32),
        compiler_params=pltpu.CompilerParams(dimension_semantics=("parallel",)),
    )(word, pos, g, b)


def distilbert_layer(x, mask_add, lp, *, n_heads, head_dim, seq_tile=None):
    B, S, H = x.shape
    F = lp["w1"].shape[1]
    tq = seq_tile if seq_tile is not None else (128 if S % 128 == 0 else S)
    n_t = S // tq
    kernel = functools.partial(_layer_kernel, n_heads=n_heads, head_dim=head_dim)

    def wspec(shape):  # weights: constant block index across the whole grid
        zeros = (0,) * len(shape)
        return pl.BlockSpec(shape, lambda b, t, _z=zeros: _z)

    in_specs = [
        pl.BlockSpec((1, tq, H), lambda b, t: (b, t, 0)),   # x rows for Q / FFN path
        pl.BlockSpec((1, S, H), lambda b, t: (b, 0, 0)),    # x full sequence for K / V
        pl.BlockSpec((1, 1, S), lambda b, t: (b, 0, 0)),    # additive attention mask
        wspec((H, H)), wspec((1, H)),                       # wq (pre-scaled), bq
        wspec((H, H)), wspec((1, H)),                       # wk, bk
        wspec((H, H)), wspec((1, H)),                       # wv, bv
        wspec((H, H)), wspec((1, H)),                       # wo, bo
        wspec((1, H)), wspec((1, H)),                       # sa_layer_norm g, b
        wspec((H, F)), wspec((1, F)),                       # ffn lin1 w, b
        wspec((F, H)), wspec((1, H)),                       # ffn lin2 w, b
        wspec((1, H)), wspec((1, H)),                       # output_layer_norm g, b
    ]
    return pl.pallas_call(
        kernel,
        grid=(B, n_t),
        in_specs=in_specs,
        out_specs=pl.BlockSpec((1, tq, H), lambda b, t: (b, t, 0)),
        out_shape=jax.ShapeDtypeStruct((B, S, H), jnp.float32),
        compiler_params=pltpu.CompilerParams(
            dimension_semantics=("parallel", "parallel"),
            vmem_limit_bytes=48 * 1024 * 1024,
        ),
    )(x, x, mask_add,
      lp["wq"], lp["bq"], lp["wk"], lp["bk"], lp["wv"], lp["bv"],
      lp["wo"], lp["bo"], lp["ln1_g"], lp["ln1_b"],
      lp["w1"], lp["b1"], lp["w2"], lp["b2"], lp["ln2_g"], lp["ln2_b"])


def classifier_head(cls_emb, w, b):
    # Pad the class dimension to a lane-dense 128 multiple; slice back in JAX.
    B, H = cls_emb.shape
    C = w.shape[1]
    C_pad = max(128, ((C + 127) // 128) * 128)
    w_p = jnp.zeros((H, C_pad), jnp.bfloat16).at[:, :C].set(w.astype(jnp.bfloat16))
    b_p = jnp.zeros((1, C_pad), jnp.float32).at[:, :C].set(b.astype(jnp.float32))
    out = pl.pallas_call(
        _fc_kernel,
        out_shape=jax.ShapeDtypeStruct((B, C_pad), jnp.float32),
    )(cls_emb, w_p, b_p)
    return out[:, :C]


def arxiv_classification_forward(params, input_ids, attention_mask, *, n_heads):
    """Equivalent of ArxivClassificationModel.forward (eval mode, dropout = identity).

    Note: the reference model is bare DistilBertModel (AutoModel) + a single nn.Linear
    on last_hidden_state[:, 0, :]; there is no pre_classifier/ReLU to replicate.
    """
    B, S = input_ids.shape
    H = params["word_emb"].shape[1]
    head_dim = H // n_heads

    # Embedding gather stays in plain JAX (data-dependent gather); add + LayerNorm
    # are fused in a Pallas kernel.
    word = jnp.take(params["word_emb"], input_ids, axis=0)          # (B, S, H) f32
    pos = params["pos_emb"][:S]                                     # (S, H) f32
    x = embeddings_add_layernorm(word, pos, params["emb_ln_g"], params["emb_ln_b"])

    # Additive mask: 0.0 where attended, -1e9 where masked (scores accumulate in f32).
    mask_add = ((1.0 - attention_mask.astype(jnp.float32)) * -1e9).reshape(B, 1, S)

    for lp in params["layers"]:
        x = distilbert_layer(x, mask_add, lp, n_heads=n_heads, head_dim=head_dim)

    cls = x[:, 0, :]                                                # last_hidden_state[:, 0, :]
    return classifier_head(cls, params["fc_w"], params["fc_b"])     # fc(embeddings)


# ----------------------------- parameter init --------------------------------

def init_params(key, *, vocab_size, max_pos, hidden, n_heads, ffn, n_layers, n_classes):
    # Weight layout: y = x @ W + b (i.e. W is the transpose of torch nn.Linear.weight).
    # Matmul weights are stored bf16; biases / LayerNorm params / embeddings stay f32.
    # wq and bq are pre-scaled by 1/sqrt(head_dim) (the attention scale is folded in).
    head_dim = hidden // n_heads
    scale = 1.0 / (head_dim ** 0.5)
    keys = iter(jax.random.split(key, 8 + 12 * n_layers))

    def nrm(shape, std=0.02):
        return std * jax.random.normal(next(keys), shape, dtype=jnp.float32)

    params = {
        "word_emb": nrm((vocab_size, hidden)),
        "pos_emb": nrm((max_pos, hidden)),
        "emb_ln_g": jnp.ones((1, hidden), jnp.float32),
        "emb_ln_b": jnp.zeros((1, hidden), jnp.float32),
        "fc_w": nrm((hidden, n_classes)),
        "fc_b": nrm((1, n_classes)),
        "layers": [],
    }
    for _ in range(n_layers):
        params["layers"].append({
            "wq": (nrm((hidden, hidden)) * scale).astype(jnp.bfloat16),
            "bq": nrm((1, hidden)) * scale,
            "wk": nrm((hidden, hidden)).astype(jnp.bfloat16), "bk": nrm((1, hidden)),
            "wv": nrm((hidden, hidden)).astype(jnp.bfloat16), "bv": nrm((1, hidden)),
            "wo": nrm((hidden, hidden)).astype(jnp.bfloat16), "bo": nrm((1, hidden)),
            "ln1_g": jnp.ones((1, hidden), jnp.float32),
            "ln1_b": jnp.zeros((1, hidden), jnp.float32),
            "w1": nrm((hidden, ffn)).astype(jnp.bfloat16), "b1": nrm((1, ffn)),
            "w2": nrm((ffn, hidden)).astype(jnp.bfloat16), "b2": nrm((1, hidden)),
            "ln2_g": jnp.ones((1, hidden), jnp.float32),
            "ln2_b": jnp.zeros((1, hidden), jnp.float32),
        })
    return params


# ----------------------------------- main -------------------------------------

if __name__ == "__main__":
    # Small synthetic config (DistilBERT-shaped, scaled down): hidden=32, 4 heads,
    # ffn=64, 2 layers, vocab=100, seq=8, batch=2, n_classes=5.
    B, S = 2, 8
    hidden, n_heads, ffn, n_layers = 32, 4, 64, 2
    vocab_size, max_pos, n_classes = 100, 16, 5

    key = jax.random.PRNGKey(0)
    pkey, ikey = jax.random.split(key)
    params = init_params(pkey, vocab_size=vocab_size, max_pos=max_pos, hidden=hidden,
                         n_heads=n_heads, ffn=ffn, n_layers=n_layers, n_classes=n_classes)

    input_ids = jax.random.randint(ikey, (B, S), 0, vocab_size, dtype=jnp.int32)
    attention_mask = jnp.array([[1, 1, 1, 1, 1, 1, 1, 1],
                                [1, 1, 1, 1, 1, 1, 0, 0]], dtype=jnp.int32)

    logits = arxiv_classification_forward(params, input_ids, attention_mask,
                                          n_heads=n_heads)
    logits = jax.block_until_ready(logits)

    assert logits.shape == (B, n_classes), logits.shape
    assert bool(jnp.all(jnp.isfinite(logits)))
    print("KERNEL_OK")
</pallas_src>

<mosaic_0001>
module attributes {stable_mosaic.version = 11 : i64} {
  func.func @_emb_layernorm_kernel(%arg0: i32, %arg1: memref<1x8x32xf32, #tpu.memory_space<vmem>>, %arg2: memref<8x32xf32, #tpu.memory_space<vmem>>, %arg3: memref<1x32xf32, #tpu.memory_space<vmem>>, %arg4: memref<1x32xf32, #tpu.memory_space<vmem>>, %arg5: memref<1x8x32xf32, #tpu.memory_space<vmem>>) attributes {dimension_semantics = [#tpu.dimension_semantics<parallel>], iteration_bounds = array<i64: 2>, scalar_prefetch = 0 : i64, scratch_operands = 0 : i64, tpu.core_type = #tpu.core_type<tc>, window_params = [{transform_indices = @transform_0, window_bounds = array<i64: 1, 8, 32>}, {pipeline_mode = #tpu.pipeline_mode<synchronous>, transform_indices = @transform_1, window_bounds = array<i64: 8, 32>}, {pipeline_mode = #tpu.pipeline_mode<synchronous>, transform_indices = @transform_2, window_bounds = array<i64: 1, 32>}, {pipeline_mode = #tpu.pipeline_mode<synchronous>, transform_indices = @transform_3, window_bounds = array<i64: 1, 32>}, {transform_indices = @transform_4, window_bounds = array<i64: 1, 8, 32>}]} {
    %c0 = arith.constant 0 : index
    %c0_0 = arith.constant 0 : index
    %c0_1 = arith.constant 0 : index
    %0 = vector.load %arg1[%c0, %c0_0, %c0_1] : memref<1x8x32xf32, #tpu.memory_space<vmem>>, vector<1x8x32xf32>
    %1 = vector.shape_cast %0 : vector<1x8x32xf32> to vector<8x32xf32>
    %c0_2 = arith.constant 0 : index
    %c0_3 = arith.constant 0 : index
    %2 = vector.load %arg2[%c0_2, %c0_3] : memref<8x32xf32, #tpu.memory_space<vmem>>, vector<8x32xf32>
    %3 = arith.addf %1, %2 : vector<8x32xf32>
    %c0_4 = arith.constant 0 : index
    %c0_5 = arith.constant 0 : index
    %4 = vector.load %arg3[%c0_4, %c0_5] : memref<1x32xf32, #tpu.memory_space<vmem>>, vector<1x32xf32>
    %c0_6 = arith.constant 0 : index
    %c0_7 = arith.constant 0 : index
    %5 = vector.load %arg4[%c0_6, %c0_7] : memref<1x32xf32, #tpu.memory_space<vmem>>, vector<1x32xf32>
    %cst = arith.constant dense<0.000000e+00> : vector<8xf32>
    %6 = vector.multi_reduction <add>, %3, %cst [1] : vector<8x32xf32> to vector<8xf32>
    %7 = vector.shape_cast %6 : vector<8xf32> to vector<8x1xf32>
    %cst_8 = arith.constant 3.200000e+01 : f32
    %8 = vector.broadcast %cst_8 : f32 to vector<8x1xf32>
    %9 = arith.divf %7, %8 : vector<8x1xf32>
    %10 = vector.broadcast %9 : vector<8x1xf32> to vector<8x32xf32>
    %11 = arith.subf %3, %10 : vector<8x32xf32>
    %12 = arith.mulf %11, %11 : vector<8x32xf32>
    %cst_9 = arith.constant dense<0.000000e+00> : vector<8xf32>
    %13 = vector.multi_reduction <add>, %12, %cst_9 [1] : vector<8x32xf32> to vector<8xf32>
    %14 = vector.shape_cast %13 : vector<8xf32> to vector<8x1xf32>
    %cst_10 = arith.constant 3.200000e+01 : f32
    %15 = vector.broadcast %cst_10 : f32 to vector<8x1xf32>
    %16 = arith.divf %14, %15 : vector<8x1xf32>
    %17 = vector.broadcast %9 : vector<8x1xf32> to vector<8x32xf32>
    %18 = arith.subf %3, %17 : vector<8x32xf32>
    %cst_11 = arith.constant 9.99999996E-13 : f32
    %19 = vector.broadcast %cst_11 : f32 to vector<8x1xf32>
    %20 = arith.addf %16, %19 : vector<8x1xf32>
    %21 = math.rsqrt %20 : vector<8x1xf32>
    %22 = vector.broadcast %21 : vector<8x1xf32> to vector<8x32xf32>
    %23 = arith.mulf %18, %22 : vector<8x32xf32>
    %24 = vector.broadcast %4 : vector<1x32xf32> to vector<8x32xf32>
    %25 = arith.mulf %23, %24 : vector<8x32xf32>
    %26 = vector.broadcast %5 : vector<1x32xf32> to vector<8x32xf32>
    %27 = arith.addf %25, %26 : vector<8x32xf32>
    %c0_12 = arith.constant 0 : index
    %c0_13 = arith.constant 0 : index
    %c0_14 = arith.constant 0 : index
    %28 = vector.load %arg5[%c0_12, %c0_13, %c0_14] : memref<1x8x32xf32, #tpu.memory_space<vmem>>, vector<1x8x32xf32>
    %29 = vector.shape_cast %28 : vector<1x8x32xf32> to vector<8x32xf32>
    %30 = vector.shape_cast %27 : vector<8x32xf32> to vector<1x8x32xf32>
    tpu.vector_store %arg5[%c0_12, %c0_13, %c0_14], %30 {strides = array<i32>} : memref<1x8x32xf32, #tpu.memory_space<vmem>>, vector<1x8x32xf32>,
    return
  }
  func.func @transform_0(%arg0: i32) -> (i32, i32, i32) {
    %c0_i32 = arith.constant 0 : i32
    %c0_i32_0 = arith.constant 0 : i32
    %c0_i32_1 = arith.constant 0 : i32
    return %arg0, %c0_i32, %c0_i32_0 : i32, i32, i32
  }
  func.func @transform_1(%arg0: i32) -> (i32, i32) {
    %c0_i32 = arith.constant 0 : i32
    %c0_i32_0 = arith.constant 0 : i32
    %c0_i32_1 = arith.constant 0 : i32
    return %c0_i32, %c0_i32_0 : i32, i32
  }
  func.func @transform_2(%arg0: i32) -> (i32, i32) {
    %c0_i32 = arith.constant 0 : i32
    %c0_i32_0 = arith.constant 0 : i32
    %c0_i32_1 = arith.constant 0 : i32
    return %c0_i32, %c0_i32_0 : i32, i32
  }
  func.func @transform_3(%arg0: i32) -> (i32, i32) {
    %c0_i32 = arith.constant 0 : i32
    %c0_i32_0 = arith.constant 0 : i32
    %c0_i32_1 = arith.constant 0 : i32
    return %c0_i32, %c0_i32_0 : i32, i32
  }
  func.func @transform_4(%arg0: i32) -> (i32, i32, i32) {
    %c0_i32 = arith.constant 0 : i32
    %c0_i32_0 = arith.constant 0 : i32
    %c0_i32_1 = arith.constant 0 : i32
    return %arg0, %c0_i32, %c0_i32_0 : i32, i32, i32
  }
}

</mosaic_0001>

<bundles_post_ra>
// kernel: tpu_custom_call.1
= control target key start
LH: loop header
LB: loop body
LE: loop exit
PB: predicated region body
PF: predicated region fallthrough
CT: control target
= control target key end

     0   :  { %9 = vsyncpa [#allocation3], 0  ;;  %s758_s0 = inlined_call_operand.hbm [shape: f32[2,8,32], index: 0, kind: input, shape index: {}]   ;;  %s759_s1 = inlined_call_operand.hbm [shape: f32[8,32], index: 1, kind: input, shape index: {}]   ;;  %s760_s2 = inlined_call_operand.vmem [shape: f32[1,32], index: 2, kind: input, shape index: {}]   ;;  %s761_s3 = inlined_call_operand.vmem [shape: f32[1,32], index: 3, kind: input, shape index: {}]   ;;  %s762_s4 = inlined_call_operand.hbm [shape: f32[2,8,32], index: 4, kind: output, shape index: {}]  }
   0x1   :  { %11 = vsyncpa [#allocation3 + $0x1], 0 }
   0x2   :  { %12 = vsyncpa [#allocation6], 0 }
   0x3   :  { %13 = vsyncpa [#allocation4], 0 }
   0x4   :  { %15 = vsyncpa [#allocation4 + $0x1], 0  ;;  %s607_s15 = smov 0   ;;  %s609_s16 = smov 0  }
   0x5   :  { %s611_s17 = smov 0   ;;  %s613_s18 = smov 0  }
   0x6 LB: > { %s628_s19 = sadd.s32 4294967295, %s578_s18   ;;  %s370_s20 = sadd.s32 4294967294, %s578_s18   ;;  %s578_s18 = sphi %s613_s18, %s772_s18   ;;  %s574_s17 = sphi %s611_s17, %s771_s17   ;;  %s570_s16 = sphi %s609_s16, %s770_s16   ;;  %s566_s15 = sphi %s607_s15, %s769_s15  }
   0x7   : > { %p41_p0 = scmp.ne.s32.totalorder %s570_s16, %s566_s15  ;;  %p42_p1 = scmp.eq.s32.totalorder %s628_s19, 0 }
   0x8   : > { %p128_p2 = scmp.eq.s32.totalorder %s628_s19, 1  ;;  %p134_p3 = scmp.eq.s32.totalorder %s370_s20, 1 }
   0x9   : > { %p637_p4 = por %p42_p1, %p41_p0  ;;  %p371_p5 = scmp.ge.s32.totalorder %s578_s18, 1 }
   0xa   : > { %p642_p6 = por %p134_p3, %p41_p0  ;;  %p141_p7 = scmp.lt.s32.totalorder %s578_s18, 3 }
   0xb   : > { %s153_s25 = sshll.u32 %s759_s1, 4  ;;  %s580_s27 = smov [#allocation5]   ;;  %s154_s25 = int_to_ptr.hbm [resolvable:$true] %s153_s25 }
   0xc   : > { %p650_p8 = pnand %p371_p5, %p141_p7  ;;  %s155_s28 = sshll.u32 %s580_s27, 4  ;;  %s156_s28 = int_to_ptr.vmem [resolvable:$true] %s155_s28 }
   0xd   : > { %s660_s29 = sadd.s32 1, %s578_s18   ;;  %s28_s30 = sadd.s32 1, %s574_s17 }
   0xe   : > { %p392_p10 = pneg %p650_p8  ;;  %s25_s5 = ssub.s32 %s578_s18, %s660_s29 }
   0xf   : > { %p26_p12 = scmp.eq.s32.totalorder %s25_s5, 0  ;;  %p35_p13 = scmp.ne.s32.totalorder %s574_s17, %s570_s16 }
  0x10   : > { %p393_p11 = pnand %p392_p10, %p42_p1  ;;  %p36_p0 = scmp.eq.s32.totalorder %s578_s18, 0 }
  0x11   : > { %s669_s6 = scalar_select %p26_p12, %s574_s17, %s28_s30  }
  0x12   : > { %395 = dma.hbm_to_vmem [thread:$0]  (!%p393_p11), %s154_s25, 128, %s156_s28, [#allocation6]  }
  0x13   : > { %p673_p3 = por %p128_p2, %p35_p13  ;;  %p405_p5 = scmp.lt.s32.totalorder %s578_s18, 2 }
  0x14   : > { %s172_s8 = sand.u32 1, %s574_s17   ;;  %s375_s9 = sshll.u32 %s578_s18, 3 }
  0x15   : > { %p37_p7 = por %p36_p0, %p35_p13  ;;  %s374_s10 = sshll.u32 %s172_s8, 3 }
  0x16   : > { %s180_s13 = scalar_lea.hbm %s758_s0, %s375_s9  ;;  %s176_s20 = scalar_lea.vmem [#allocation2], %s374_s10 }
  0x17   : > { %s182_s14 = sshll.u32 %s180_s13, 4  ;;  %s184_s23 = sshll.u32 %s176_s20, 4  ;;  %s183_s14 = int_to_ptr.hbm [resolvable:$true] %s182_s14  ;;  %s185_s23 = int_to_ptr.vmem [resolvable:$true] %s184_s23 }
  0x18   : > { %p683_p10 = pnand %p405_p5, %p37_p7  ;;  %s173_s25 = scalar_lea.sflag [#allocation3], %s172_s8 }
  0x19   : > { %s478_s27 = sshra.s32 %s183_s14, 4  ;;  %s485_s9 = scalar_lea.hbm %s758_s0, 16  ;;  %s479_s27 = int_to_ptr.hbm [resolvable:$true] %s478_s27 }
  0x1a   : > { %s480_s28 = scalar_lea.hbm %s479_s27, 8  ;;  %p482_p11 = pneg %p683_p10 }
  0x1b   : > { %p481_p2 = scmp.ne.s32.totalorder %s479_s27, %s480_s28  ;;  %p486_p0 = scmp.lt.s32.totalorder %s479_s27, %s758_s0 }
  0x1c   : > { %p487_p5 = scmp.lt.s32.totalorder %s485_s9, %s480_s28 }
  0x1d   : > { %p483_p12 = pnand %p482_p11, %p481_p2 }
  0x1e   : > { %p488_p7 = por %p487_p5, %p486_p0 }
  0x1f   : > { %p484_p13 = pneg %p483_p12 }
  0x21   : > { %p489_p9 = pnand %p488_p7, %p484_p13 }
  0x23   : > { %492 = shalt.err (!%p489_p9)
}
  0x24   : > { %399 = dma.hbm_to_vmem [thread:$0]  (!%p683_p10), %s183_s14, 128, %s185_s23, %s173_s25  }
  0x25   : > { %193 = sbr.rel (%p650_p8) target bundleno = 319 (0x13f), region = 36  ;;  %s700_s8 = sand.u32 (!%p650_p8), 1, %s570_s16  }
  0x26   : > { %s377_s12 = sshll.u32 (!%p650_p8), %s700_s8, 3  ;;  %s196_s13 = scalar_lea.sflag (!%p650_p8), [#allocation3], %s700_s8 }
  0x27   : > { %s199_s20 = scalar_lea.vmem (!%p650_p8), [#allocation2], %s377_s12 }
  0x2a   : > { %553 = dma.done.wait (%p637_p4), %s196_s13, 128  }
  0x2b   : > { %555 = vsyncadd (%p637_p4), %s196_s13, 4294967168 }
  0x2c   : > { %557 = dma.done.wait (%p42_p1), [#allocation6], 128  }
  0x2d   : > { %559 = vsyncadd (%p42_p1), [#allocation6], 4294967168  ;;  %v230_v0 = vld [vmem:[%s199_s20] sm:$0xff]  ;;  %v231_v1 = vld [vmem:[#allocation5] sm:$0xff]  ;;  %vm235_vm0 = vcmask 261120   ;;  %v581_v4 = vmov 32.0  }
  0x2e   : > { %v232_v2 = vadd.f32 %v231_v1, %v230_v0  ;;  %444 = vrcp.f32 %v581_v4  ;;  %s381_s21 = sshll.u32 %s628_s19, 3  ;;  %v442_v25 = vld [vmem:[%s760_s2] ss:$0 sm:$0xff]  ;;  %s229_s19 = scalar_lea.vmem [#allocation7], %s377_s12 }
  0x2f   : > { %s285_s25 = scalar_lea.hbm %s762_s4, %s381_s21  ;;  %v443_v28 = vld [vmem:[%s761_s3] ss:$0 sm:$0xff]  ;;  %s287_s30 = sshll.u32 %s229_s19, 4  ;;  %s288_s30 = int_to_ptr.vmem [resolvable:$true] %s287_s30 }
  0x30   : > { %v236_v3 = vsel %vm235_vm0, %v232_v2, 0.0  ;;  %s289_s5 = sshll.u32 %s285_s25, 4  ;;  %s275_s9 = scalar_lea.sflag [#allocation4], %s700_s8  ;;  %s290_s5 = int_to_ptr.hbm [resolvable:$true] %s289_s5 }
  0x31   : > { %237 = vadd.xlane.f32.xlu0 %v236_v3  ;;  %s522_s10 = sshra.s32 %s290_s5, 4  ;;  %s528_s12 = scalar_lea.hbm %s762_s4, 16  ;;  %s523_s10 = int_to_ptr.hbm [resolvable:$true] %s522_s10 }
  0x32   : > { %s524_s11 = scalar_lea.hbm %s523_s10, 8  ;;  %p529_p9 = scmp.lt.s32.totalorder %s523_s10, %s762_s4 }
  0x33   : > { %p525_p1 = scmp.ne.s32.totalorder %s523_s10, %s524_s11  ;;  %p530_p10 = scmp.lt.s32.totalorder %s528_s12, %s524_s11 }
  0x34   : > { %v445_v5 = vpop.eup %444 }
  0x35   : > { %v240_v6 = vmul.f32 32.0, %v445_v5  ;;  %vm244_vm1 = vweird.f32 %v445_v5  ;;  %p526_p4 = pnand %p525_p1, %p673_p3  ;;  %p531_p2 = por %p530_p10, %p529_p9 }
  0x37   : > { %v241_v7 = vsub.f32 1.0, %v240_v6  ;;  %p527_p8 = pneg %p526_p4 }
  0x39   : > { %v242_v8 = vmul.f32 %v445_v5, %v241_v7  ;;  %p532_p11 = pnand %p531_p2, %p527_p8 }
  0x3b   : > { %v243_v9 = vadd.f32 %v445_v5, %v242_v8 }
  0x3d   : > { %v245_v10 = vsel %vm244_vm1, %v445_v5, %v243_v9 }
  0xa4   : > { %v238_v11 = vpop.xlane.xlu0 %237 }
  0xa5   : > { %v246_v12 = vmul.f32 %v245_v10, %v238_v11 }
  0xa7   : > { %v247_v13 = vsub.f32 %v232_v2, %v246_v12 }
  0xa9   : > { %v248_v14 = vmul.f32 %v247_v13, %v247_v13 }
  0xab   : > { %v249_v15 = vsel %vm235_vm0, %v248_v14, 0.0 }
  0xac   : > { %250 = vadd.xlane.f32.xlu0 %v249_v15 }
 0x11f   : > { %v251_v16 = vpop.xlane.xlu0 %250 }
 0x120   : > { %v252_v17 = vmul.f32 %v251_v16, %v245_v10 }
 0x122   : > { %v253_v18 = vadd.f32 1e-12, %v252_v17 }
 0x124   : > { %446 = vrsqrt.f32 %v253_v18  ;;  %vm260_vm3 = vweird.f32 %v253_v18 }
 0x12a   : > { %v447_v19 = vpop.eup %446 }
 0x12b   : > { %v255_v20 = vmul.f32 %v447_v19, %v253_v18  ;;  %vm261_vm2 = vweird.f32 %v447_v19 }
 0x12c   : > { %vm262_vm4 = vmor %vm260_vm3, %vm261_vm2 }
 0x12d   : > { %v256_v21 = vmul.f32 %v447_v19, %v255_v20 }
 0x12f   : > { %v257_v22 = vmul.f32 0.5, %v256_v21 }
 0x131   : > { %v258_v23 = vsub.f32 1.5, %v257_v22 }
 0x133   : > { %v259_v24 = vmul.f32 %v447_v19, %v258_v23 }
 0x135   : > { %v263_v26 = vsel %vm262_vm4, %v447_v19, %v259_v24 }
 0x136   : > { %v264_v27 = vmul.f32 %v263_v26, %v247_v13 }
 0x138   : > { %v268_v29 = vmul.f32 %v442_v25, %v264_v27 }
 0x13a   : > { %v272_v30 = vadd.f32 %v443_v28, %v268_v29 }
 0x13c   : > { %273 = vst.msk [vmem:[%s229_s19] sm:$0xff] %vm235_vm0, %v272_v30 }
 0x13d   : > { %535 = shalt.err (!%p532_p11)
}
 0x13e   : > { %390 = dma.vmem_to_hbm [thread:$0]  (%p673_p3), %s288_s30, 128, %s290_s5, %s275_s9  }
 0x13f PF: > { %s301_s8 = sand.u32 1, %s566_s15   ;;  %p768_p12 = scmp.ge.s32.totalorder %s578_s18, 2 }
 0x140   : > { %s302_s14 = scalar_lea.sflag [#allocation4], %s301_s8 }
 0x141   : > { %p401_p13 = pnand %p768_p12, %p642_p6 }
 0x143   : > { %p402_p0 = pneg %p401_p13 }
 0x145   : > { %561 = dma.done.wait (%p402_p0), %s302_s14, 128  }
 0x146   : > { %563 = vsyncadd (%p402_p0), %s302_s14, 4294967168  ;;  %p18_p5 = scmp.ge.s32.totalorder %s660_s29, 4   ;;  %s769_s15 = smov %s570_s16 }
 0x147   : > { %s770_s16 = smov %s574_s17  ;;  %s771_s17 = smov %s669_s6 }
 0x148   : > { %s772_s18 = smov %s660_s29  ;;  %20 = sbr.rel (!%p18_p5) target bundleno = 6 (0x6), region = 85 }
 0x14d   :  { %308 = vsyncpa [#allocation3], 1 }
 0x14e   :  { %310 = vsyncpa [#allocation3 + $0x1], 1 }
 0x14f   :  { %311 = vsyncpa [#allocation6], 1 }
 0x150   :  { %312 = vsyncpa [#allocation4], 1 }
 0x151   :  { %314 = vsyncpa [#allocation4 + $0x1], 1 }

</bundles_post_ra>
